<compile_context>
chip_gen: v7x
topology: tpu7x:2x2x1
jax: 0.10.0
libtpu: 0.0.40
codegen_flags: <defaults>
</compile_context>

<pallas_src>
import functools

import jax
import jax.numpy as jnp
from jax import lax
from jax.experimental import pallas as pl
from jax.experimental.pallas import tpu as pltpu


def _round_up(a: int, b: int) -> int:
    return (a + b - 1) // b * b


def _mlp_resnet_block_kernel(x_ref, pool_ref, w1_ref, b1_ref, w2_ref, b2_ref, o_ref,
                             *, use_layer_norm, mxu_dtype, eps):
    """One batch tile (all operands lane-dense, 128 lanes wide).

    x_ref / o_ref : (R_TILE, pack*D)        `pack` samples per slab row
    pool_ref      : (pack*D, pack*D)  f32   kron(I_pack, ones(D,D)/D) group-average matrix
    w1_ref        : (pack*D, pack*4D)       block-diagonal fc1 (LN affine folded in)
    b1_ref        : (1, pack*4D)      f32
    w2_ref        : (pack*4D, pack*D)       block-diagonal fc2
    b2_ref        : (1, pack*D)       f32
    """
    x = x_ref[...].astype(jnp.float32)            # (R, 128)
    residual = x                                  # residual taken before LN (matches module)

    if use_layer_norm:
        # Per-sample LayerNorm == per D-lane-group normalization in the packed
        # layout.  Group stats via MXU "pooling" matmuls (f32), no XLU reductions.
        mean = jnp.dot(x, pool_ref[...], preferred_element_type=jnp.float32)
        c = x - mean
        var = jnp.dot(c * c, pool_ref[...], preferred_element_type=jnp.float32)
        xn = c * lax.rsqrt(var + eps)             # nn.LayerNorm default eps
        # gamma/beta were folded into w1/b1 at pack time.
    else:
        xn = x

    # fc1 (+ folded LN affine) -> ReLU -> fc2, f32 accumulation on the MXU.
    h = jnp.dot(xn.astype(mxu_dtype), w1_ref[...],
                preferred_element_type=jnp.float32) + b1_ref[...]
    h = jnp.maximum(h, 0.0)                       # activations = ReLU
    y = jnp.dot(h.astype(mxu_dtype), w2_ref[...],
                preferred_element_type=jnp.float32) + b2_ref[...]

    # Residual add; fc2 out dim == hidden_dim so shapes always match and the
    # module's `self.residual` Linear is never applied.
    o_ref[...] = (residual + y).astype(o_ref.dtype)


def pack_mlp_resnet_params(gamma, beta, w1, b1, w2, b2, *,
                           use_layer_norm=True,
                           mxu_dtype=jnp.bfloat16):
    """One-time parameter packing (call once per parameter set, not per step).

    w1: (D, 4D), b1: (4D,), w2: (4D, D), b2: (D,)  -- weights pre-transposed so y = x @ W + b.
    Returns a dict of VMEM-ready packed arrays + static layout info.
    """
    D, H = w1.shape
    assert w2.shape == (H, D) and b1.shape == (H,) and b2.shape == (D,)

    # Fold the LayerNorm affine into fc1 (exact reparameterization in f32):
    #   w1' = gamma[:,None] * w1,   b1' = b1 + beta @ w1
    if use_layer_norm:
        w1f = w1.astype(jnp.float32) * gamma.astype(jnp.float32)[:, None]
        b1f = b1.astype(jnp.float32) + beta.astype(jnp.float32) @ w1.astype(jnp.float32)
    else:
        w1f, b1f = w1.astype(jnp.float32), b1.astype(jnp.float32)

    # Lane packing: put `pack` samples per 128-lane slab row.
    pack = 128 // D if (128 % D == 0 and D < 128) else 1
    L = pack * D

    eye = jnp.eye(pack, dtype=jnp.float32)
    w1_bd = jnp.kron(eye, w1f).astype(mxu_dtype)                      # (L, pack*H)
    w2_bd = jnp.kron(eye, w2.astype(jnp.float32)).astype(mxu_dtype)   # (pack*H, L)
    b1_t = jnp.tile(b1f, pack).reshape(1, pack * H).astype(jnp.float32)
    b2_t = jnp.tile(b2.astype(jnp.float32), pack).reshape(1, L)
    # Block-averaging matrix for LN group statistics on the MXU (kept f32).
    pool = jnp.kron(eye, jnp.full((D, D), 1.0 / D, dtype=jnp.float32))  # (L, L)

    return dict(feat_dim=D, hidden=H, pack=pack,
                use_layer_norm=use_layer_norm, mxu_dtype=mxu_dtype,
                w1=w1_bd, b1=b1_t, w2=w2_bd, b2=b2_t, pool=pool)


def mlp_resnet_block(x, params, *, block_batch=4096):
    """Forward pass of MLPResNetBlock.  x: (B, D); `params` from pack_mlp_resnet_params.

    block_batch ~4096 keeps the per-step VMEM footprint well under v5e's 16 MiB
    scoped default; raise it on v6e/v7x only after profiling.  Passing a bf16 `x`
    halves the HBM activation traffic (LN stats still computed in f32 in-kernel).
    """
    B, D = x.shape
    assert D == params["feat_dim"], "hidden_dim mismatch"
    pack, H = params["pack"], params["hidden"]
    L = pack * D

    # Minimal padding: only to a multiple of pack*8 rows (<= pack*8 - 1 extra
    # rows), so the slab reshape is free and slab rows stay a multiple of 8.
    row_gran = pack * 8
    B_pad = _round_up(B, row_gran)
    x_in = jnp.pad(x, ((0, B_pad - B), (0, 0))) if B_pad != B else x

    r_total = B_pad // pack
    x_slab = x_in.reshape(r_total, L)             # free on row-major data

    # Batch tile: as large as block_batch allows, but split so the grid has
    # >= 2 steps when possible (v7x megacore sharding of the parallel axis).
    max_rt = max(8, (min(block_batch, B_pad) // pack) // 8 * 8)
    half_rt = _round_up(pl.cdiv(r_total, 2), 8)
    r_tile = max(8, min(max_rt, half_rt, r_total))
    grid = (pl.cdiv(r_total, r_tile),)            # Pallas masks the boundary block

    kernel = functools.partial(
        _mlp_resnet_block_kernel,
        use_layer_norm=params["use_layer_norm"],
        mxu_dtype=params["mxu_dtype"],
        eps=1e-5)

    out_slab = pl.pallas_call(
        kernel,
        out_shape=jax.ShapeDtypeStruct((r_total, L), x.dtype),
        grid=grid,
        in_specs=[
            pl.BlockSpec((r_tile, L), lambda i: (i, 0)),        # streamed activations
            pl.BlockSpec((L, L), lambda i: (0, 0)),             # pooling matrix (resident)
            pl.BlockSpec((L, pack * H), lambda i: (0, 0)),      # fc1 (resident)
            pl.BlockSpec((1, pack * H), lambda i: (0, 0)),
            pl.BlockSpec((pack * H, L), lambda i: (0, 0)),      # fc2 (resident)
            pl.BlockSpec((1, L), lambda i: (0, 0)),
        ],
        out_specs=pl.BlockSpec((r_tile, L), lambda i: (i, 0)),
        compiler_params=pltpu.CompilerParams(
            dimension_semantics=("parallel",)),                 # megacore on v7x; no-op on v5e/v6e
    )(x_slab, params["pool"], params["w1"], params["b1"], params["w2"], params["b2"])

    return out_slab.reshape(B_pad, D)[:B]


def reference_block(x, gamma, beta, w1, b1, w2, b2, use_layer_norm=True):
    """Plain-JAX reference matching the PyTorch forward (eval mode, ReLU)."""
    residual = x
    h = x
    if use_layer_norm:
        mean = jnp.mean(h, axis=-1, keepdims=True)
        var = jnp.mean((h - mean) ** 2, axis=-1, keepdims=True)
        h = (h - mean) / jnp.sqrt(var + 1e-5) * gamma + beta
    h = jnp.maximum(h @ w1 + b1, 0.0)
    h = h @ w2 + b2
    return residual + h


if __name__ == "__main__":
    hidden_dim = 32
    key = jax.random.PRNGKey(0)
    kx, kg, kb, k1, k2, k3, k4, kx2 = jax.random.split(key, 8)

    # LayerNorm params (non-trivial to exercise the affine fold).
    gamma = 1.0 + 0.1 * jax.random.normal(kg, (hidden_dim,), jnp.float32)
    beta = 0.1 * jax.random.normal(kb, (hidden_dim,), jnp.float32)
    # fc1: Linear(D, 4D) stored as (D, 4D); fc2: Linear(4D, D) stored as (4D, D).
    w1 = jax.random.normal(k1, (hidden_dim, 4 * hidden_dim), jnp.float32) * 0.05
    b1 = jax.random.normal(k2, (4 * hidden_dim,), jnp.float32) * 0.05
    w2 = jax.random.normal(k3, (4 * hidden_dim, hidden_dim), jnp.float32) * 0.05
    b2 = jax.random.normal(k4, (hidden_dim,), jnp.float32) * 0.05

    # Pack once per parameter set (hoisted out of the per-call wrapper).
    params_bf16 = pack_mlp_resnet_params(gamma, beta, w1, b1, w2, b2,
                                         use_layer_norm=True, mxu_dtype=jnp.bfloat16)
    params_f32 = pack_mlp_resnet_params(gamma, beta, w1, b1, w2, b2,
                                        use_layer_norm=True, mxu_dtype=jnp.float32)

    # --- small batch (B=8): single grid step, f32 MXU operands ----------------
    x_small = jax.random.normal(kx, (8, hidden_dim), jnp.float32)
    out = jax.block_until_ready(mlp_resnet_block(x_small, params_f32))
    ref = reference_block(x_small, gamma, beta, w1, b1, w2, b2)
    assert out.shape == x_small.shape
    assert jnp.allclose(out, ref, atol=2e-3, rtol=2e-3)

    # --- larger ragged batch (B=1000): batch grid (>=2 steps) + tail masking --
    x_big = jax.random.normal(kx2, (1000, hidden_dim), jnp.float32)
    ref_big = reference_block(x_big, gamma, beta, w1, b1, w2, b2)

    out_big_f32 = jax.block_until_ready(mlp_resnet_block(x_big, params_f32))
    assert out_big_f32.shape == x_big.shape
    assert jnp.allclose(out_big_f32, ref_big, atol=2e-3, rtol=2e-3)

    # Default bf16 MXU operands (all generations); LN stats / residual stay f32.
    out_big_bf16 = jax.block_until_ready(mlp_resnet_block(x_big, params_bf16))
    assert jnp.allclose(out_big_bf16, ref_big, atol=5e-2, rtol=5e-2)

    print("KERNEL_OK")
</pallas_src>

<mosaic_0001>
module attributes {stable_mosaic.version = 11 : i64} {
  func.func @_mlp_resnet_block_kernel(%arg0: i32, %arg1: memref<8x128xf32, #tpu.memory_space<vmem>>, %arg2: memref<128x128xf32, #tpu.memory_space<vmem>>, %arg3: memref<128x512xf32, #tpu.memory_space<vmem>>, %arg4: memref<1x512xf32, #tpu.memory_space<vmem>>, %arg5: memref<512x128xf32, #tpu.memory_space<vmem>>, %arg6: memref<1x128xf32, #tpu.memory_space<vmem>>, %arg7: memref<8x128xf32, #tpu.memory_space<vmem>>) attributes {dimension_semantics = [#tpu.dimension_semantics<parallel>], iteration_bounds = array<i64: 1>, scalar_prefetch = 0 : i64, scratch_operands = 0 : i64, tpu.core_type = #tpu.core_type<tc>, window_params = [{transform_indices = @transform_0, window_bounds = array<i64: 8, 128>}, {pipeline_mode = #tpu.pipeline_mode<synchronous>, transform_indices = @transform_1, window_bounds = array<i64: 128, 128>}, {pipeline_mode = #tpu.pipeline_mode<synchronous>, transform_indices = @transform_2, window_bounds = array<i64: 128, 512>}, {pipeline_mode = #tpu.pipeline_mode<synchronous>, transform_indices = @transform_3, window_bounds = array<i64: 1, 512>}, {pipeline_mode = #tpu.pipeline_mode<synchronous>, transform_indices = @transform_4, window_bounds = array<i64: 512, 128>}, {pipeline_mode = #tpu.pipeline_mode<synchronous>, transform_indices = @transform_5, window_bounds = array<i64: 1, 128>}, {transform_indices = @transform_6, window_bounds = array<i64: 8, 128>}]} {
    %c0 = arith.constant 0 : index
    %c0_0 = arith.constant 0 : index
    %0 = vector.load %arg1[%c0, %c0_0] : memref<8x128xf32, #tpu.memory_space<vmem>>, vector<8x128xf32>
    %c0_1 = arith.constant 0 : index
    %c0_2 = arith.constant 0 : index
    %1 = vector.load %arg2[%c0_1, %c0_2] : memref<128x128xf32, #tpu.memory_space<vmem>>, vector<128x128xf32>
    %cst = arith.constant dense<0.000000e+00> : vector<8x128xf32>
    %2 = tpu.matmul %0, %1, %cst {dimension_numbers = #tpu.dot_dimension_numbers<[1], [0], [0], [1], [0, 0, 1, 1], [], []>} : vector<8x128xf32>, vector<128x128xf32>, vector<8x128xf32> -> vector<8x128xf32>
    %3 = arith.subf %0, %2 : vector<8x128xf32>
    %4 = arith.mulf %3, %3 : vector<8x128xf32>
    %c0_3 = arith.constant 0 : index
    %c0_4 = arith.constant 0 : index
    %5 = vector.load %arg2[%c0_3, %c0_4] : memref<128x128xf32, #tpu.memory_space<vmem>>, vector<128x128xf32>
    %cst_5 = arith.constant dense<0.000000e+00> : vector<8x128xf32>
    %6 = tpu.matmul %4, %5, %cst_5 {dimension_numbers = #tpu.dot_dimension_numbers<[1], [0], [0], [1], [0, 0, 1, 1], [], []>} : vector<8x128xf32>, vector<128x128xf32>, vector<8x128xf32> -> vector<8x128xf32>
    %cst_6 = arith.constant 9.99999974E-6 : f32
    %7 = vector.broadcast %cst_6 : f32 to vector<8x128xf32>
    %8 = arith.addf %6, %7 : vector<8x128xf32>
    %9 = math.rsqrt %8 : vector<8x128xf32>
    %10 = arith.mulf %3, %9 : vector<8x128xf32>
    %c0_7 = arith.constant 0 : index
    %c0_8 = arith.constant 0 : index
    %11 = vector.load %arg3[%c0_7, %c0_8] : memref<128x512xf32, #tpu.memory_space<vmem>>, vector<128x512xf32>
    %cst_9 = arith.constant dense<0.000000e+00> : vector<8x512xf32>
    %12 = tpu.matmul %10, %11, %cst_9 {dimension_numbers = #tpu.dot_dimension_numbers<[1], [0], [0], [1], [0, 0, 1, 1], [], []>} : vector<8x128xf32>, vector<128x512xf32>, vector<8x512xf32> -> vector<8x512xf32>
    %c0_10 = arith.constant 0 : index
    %c0_11 = arith.constant 0 : index
    %13 = vector.load %arg4[%c0_10, %c0_11] : memref<1x512xf32, #tpu.memory_space<vmem>>, vector<1x512xf32>
    %14 = vector.broadcast %13 : vector<1x512xf32> to vector<8x512xf32>
    %15 = arith.addf %12, %14 : vector<8x512xf32>
    %cst_12 = arith.constant 0.000000e+00 : f32
    %16 = vector.broadcast %cst_12 : f32 to vector<8x512xf32>
    %17 = arith.maximumf %15, %16 : vector<8x512xf32>
    %c0_13 = arith.constant 0 : index
    %c0_14 = arith.constant 0 : index
    %18 = vector.load %arg5[%c0_13, %c0_14] : memref<512x128xf32, #tpu.memory_space<vmem>>, vector<512x128xf32>
    %cst_15 = arith.constant dense<0.000000e+00> : vector<8x128xf32>
    %19 = tpu.matmul %17, %18, %cst_15 {dimension_numbers = #tpu.dot_dimension_numbers<[1], [0], [0], [1], [0, 0, 1, 1], [], []>} : vector<8x512xf32>, vector<512x128xf32>, vector<8x128xf32> -> vector<8x128xf32>
    %c0_16 = arith.constant 0 : index
    %c0_17 = arith.constant 0 : index
    %20 = vector.load %arg6[%c0_16, %c0_17] : memref<1x128xf32, #tpu.memory_space<vmem>>, vector<1x128xf32>
    %21 = vector.broadcast %20 : vector<1x128xf32> to vector<8x128xf32>
    %22 = arith.addf %19, %21 : vector<8x128xf32>
    %23 = arith.addf %0, %22 : vector<8x128xf32>
    %c0_18 = arith.constant 0 : index
    %c0_19 = arith.constant 0 : index
    %24 = vector.load %arg7[%c0_18, %c0_19] : memref<8x128xf32, #tpu.memory_space<vmem>>, vector<8x128xf32>
    tpu.vector_store %arg7[%c0_18, %c0_19], %23 {strides = array<i32>} : memref<8x128xf32, #tpu.memory_space<vmem>>, vector<8x128xf32>,
    return
  }
  func.func @transform_0(%arg0: i32) -> (i32, i32) {
    %c0_i32 = arith.constant 0 : i32
    %c0_i32_0 = arith.constant 0 : i32
    return %arg0, %c0_i32 : i32, i32
  }
  func.func @transform_1(%arg0: i32) -> (i32, i32) {
    %c0_i32 = arith.constant 0 : i32
    %c0_i32_0 = arith.constant 0 : i32
    %c0_i32_1 = arith.constant 0 : i32
    return %c0_i32, %c0_i32_0 : i32, i32
  }
  func.func @transform_2(%arg0: i32) -> (i32, i32) {
    %c0_i32 = arith.constant 0 : i32
    %c0_i32_0 = arith.constant 0 : i32
    %c0_i32_1 = arith.constant 0 : i32
    return %c0_i32, %c0_i32_0 : i32, i32
  }
  func.func @transform_3(%arg0: i32) -> (i32, i32) {
    %c0_i32 = arith.constant 0 : i32
    %c0_i32_0 = arith.constant 0 : i32
    %c0_i32_1 = arith.constant 0 : i32
    return %c0_i32, %c0_i32_0 : i32, i32
  }
  func.func @transform_4(%arg0: i32) -> (i32, i32) {
    %c0_i32 = arith.constant 0 : i32
    %c0_i32_0 = arith.constant 0 : i32
    %c0_i32_1 = arith.constant 0 : i32
    return %c0_i32, %c0_i32_0 : i32, i32
  }
  func.func @transform_5(%arg0: i32) -> (i32, i32) {
    %c0_i32 = arith.constant 0 : i32
    %c0_i32_0 = arith.constant 0 : i32
    %c0_i32_1 = arith.constant 0 : i32
    return %c0_i32, %c0_i32_0 : i32, i32
  }
  func.func @transform_6(%arg0: i32) -> (i32, i32) {
    %c0_i32 = arith.constant 0 : i32
    %c0_i32_0 = arith.constant 0 : i32
    return %arg0, %c0_i32 : i32, i32
  }
}

</mosaic_0001>

<bundles_post_ra>
// kernel: tpu_custom_call.1
= control target key start
LH: loop header
LB: loop body
LE: loop exit
PB: predicated region body
PF: predicated region fallthrough
CT: control target
= control target key end

     0   :  { %11 = vsyncpa [#allocation3], 0  ;;  %s1316_s0 = inlined_call_operand.hbm [shape: f32[8,128], index: 0, kind: input, shape index: {}]   ;;  %s1317_s1 = inlined_call_operand.hbm [shape: f32[128,128], index: 1, kind: input, shape index: {}]   ;;  %s1318_s2 = inlined_call_operand.hbm [shape: f32[128,512], index: 2, kind: input, shape index: {}]   ;;  %s1319_s3 = inlined_call_operand.vmem [shape: f32[1,512], index: 3, kind: input, shape index: {}]   ;;  %s1320_s4 = inlined_call_operand.hbm [shape: f32[512,128], index: 4, kind: input, shape index: {}]   ;;  %s1321_s5 = inlined_call_operand.vmem [shape: f32[1,128], index: 5, kind: input, shape index: {}]   ;;  %s1322_s6 = inlined_call_operand.hbm [shape: f32[8,128], index: 6, kind: output, shape index: {}]  }
   0x1   :  { %12 = vsyncpa [#allocation6], 0 }
   0x2   :  { %13 = vsyncpa [#allocation9], 0 }
   0x3   :  { %14 = vsyncpa [#allocation4], 0  ;;  %s1183_s21 = smov [#allocation5]   ;;  %s1065_s25 = scalar_lea.hbm %s1317_s1, 2048 }
   0x4   :  { %s30_s22 = sshll.u32 %s1183_s21, 4  ;;  %p1066_p0 = scmp.ne.s32.totalorder %s1317_s1, %s1065_s25  ;;  %s31_s22 = int_to_ptr.vmem [resolvable:$true] %s30_s22 }
   0x5   :  { %p1069_p1 = scmp.lt.u32.totalorder %s1065_s25, %s1317_s1 }
   0x7   :  { %p1071_p2 = pnand %p1069_p1, %p1066_p0 }
   0x9   :  { %1074 = shalt.err (!%p1071_p2)
}
   0xa   :  { %s1075_s30 = scalar_lea.vmem %s31_s22, 2048  ;;  %p1080_p4 = scmp.lt.s32.totalorder %s31_s22, %s31_s22 }
   0xb   :  { %p1076_p3 = scmp.ne.s32.totalorder %s31_s22, %s1075_s30  ;;  %p1081_p5 = scmp.lt.s32.totalorder %s1075_s30, %s1075_s30 }
   0xd   :  { %p1082_p6 = por %p1081_p5, %p1080_p4 }
   0xf   :  { %p1083_p7 = pnand %p1082_p6, %p1076_p3 }
  0x11   :  { %1086 = shalt.err (!%p1083_p7)
}
  0x12   :  { %s1184_s7 = smov 128   ;;  %s1185_s8 = smov 8  }
  0x13   :  { %36 = dma.hbm_to_vmem [thread:$0]  %s1317_s1, 2048, %s31_s22, [#allocation6], %s1184_s7, %s1184_s7, %s1185_s8  }
  0x14   :  { %s1186_s11 = smov [#allocation2]   ;;  %s1187_s13 = smov [#allocation7]  }
  0x15   :  { %s21_s12 = sshll.u32 %s1186_s11, 4  ;;  %s42_s14 = sshll.u32 %s1187_s13, 4  ;;  %s22_s12 = int_to_ptr.vmem [resolvable:$true] %s21_s12  ;;  %s43_s14 = int_to_ptr.vmem [resolvable:$true] %s42_s14 }
  0x16   :  { %s1087_s17 = scalar_lea.hbm %s1316_s0, 128 }
  0x17   :  { %p1088_p8 = scmp.ne.s32.totalorder %s1316_s0, %s1087_s17  ;;  %p1091_p9 = scmp.lt.u32.totalorder %s1087_s17, %s1316_s0 }
  0x19   :  { %p1093_p10 = pnand %p1091_p9, %p1088_p8 }
  0x1b   :  { %1096 = shalt.err (!%p1093_p10)
}
  0x1c   :  { %s1097_s1 = scalar_lea.vmem %s22_s12, 128  ;;  %p1102_p12 = scmp.lt.s32.totalorder %s22_s12, %s22_s12 }
  0x1d   :  { %p1098_p11 = scmp.ne.s32.totalorder %s22_s12, %s1097_s1  ;;  %p1103_p13 = scmp.lt.s32.totalorder %s1097_s1, %s1097_s1 }
  0x1f   :  { %p1104_p0 = por %p1103_p13, %p1102_p12 }
  0x21   :  { %p1105_p1 = pnand %p1104_p0, %p1098_p11 }
  0x23   :  { %1108 = shalt.err (!%p1105_p1)
}
  0x24   :  { %24 = dma.hbm_to_vmem [thread:$0]  %s1316_s0, 128, %s22_s12, [#allocation3]  }
  0x25   :  { %s1109_s26 = scalar_lea.hbm %s1318_s2, 8192 }
  0x26   :  { %p1110_p2 = scmp.ne.s32.totalorder %s1318_s2, %s1109_s26  ;;  %p1113_p3 = scmp.lt.u32.totalorder %s1109_s26, %s1318_s2 }
  0x28   :  { %p1115_p4 = pnand %p1113_p3, %p1110_p2 }
  0x2a   :  { %1118 = shalt.err (!%p1115_p4)
}
  0x2b   :  { %s1119_s9 = scalar_lea.vmem %s43_s14, 8192  ;;  %p1124_p6 = scmp.lt.s32.totalorder %s43_s14, %s43_s14 }
  0x2c   :  { %p1120_p5 = scmp.ne.s32.totalorder %s43_s14, %s1119_s9  ;;  %p1125_p7 = scmp.lt.s32.totalorder %s1119_s9, %s1119_s9 }
  0x2e   :  { %p1126_p8 = por %p1125_p7, %p1124_p6 }
  0x30   :  { %p1127_p9 = pnand %p1126_p8, %p1120_p5 }
  0x32   :  { %1130 = shalt.err (!%p1127_p9)
}
  0x33   :  { %s1188_s0 = smov 512   ;;  %s1189_s10 = smov 32  }
  0x34   :  { %48 = dma.hbm_to_vmem [thread:$0]  %s1318_s2, 8192, %s43_s14, [#allocation6], %s1188_s0, %s1188_s0, %s1189_s10  }
  0x35   :  { %s1190_s13 = smov [#allocation8]   ;;  %s1131_s18 = scalar_lea.hbm %s1320_s4, 8192 }
  0x36   :  { %s56_s15 = sshll.u32 %s1190_s13, 4  ;;  %p1132_p10 = scmp.ne.s32.totalorder %s1320_s4, %s1131_s18  ;;  %s57_s15 = int_to_ptr.vmem [resolvable:$true] %s56_s15 }
  0x37   :  { %p1135_p11 = scmp.lt.u32.totalorder %s1131_s18, %s1320_s4 }
  0x39   :  { %p1137_p12 = pnand %p1135_p11, %p1132_p10 }
  0x3b   :  { %1140 = shalt.err (!%p1137_p12)
}
  0x3c   :  { %s1141_s22 = scalar_lea.vmem %s57_s15, 8192  ;;  %p1146_p0 = scmp.lt.s32.totalorder %s57_s15, %s57_s15 }
  0x3d   :  { %p1142_p13 = scmp.ne.s32.totalorder %s57_s15, %s1141_s22  ;;  %p1147_p1 = scmp.lt.s32.totalorder %s1141_s22, %s1141_s22 }
  0x3f   :  { %p1148_p2 = por %p1147_p1, %p1146_p0 }
  0x41   :  { %p1149_p3 = pnand %p1148_p2, %p1142_p13 }
  0x43   :  { %1152 = shalt.err (!%p1149_p3)
}
  0x44   :  { %62 = dma.hbm_to_vmem [thread:$0]  %s1320_s4, 8192, %s57_s15, [#allocation9], %s1184_s7, %s1184_s7, %s1185_s8  }
  0x45   :  { %1175 = dma.done.wait [#allocation3], 128  }
  0x46   :  { %1176 = vsyncadd [#allocation3], 4294967168 }
  0x47   :  { %1177 = dma.done.wait [#allocation6], 10240  }
  0x48   :  { %1178 = vsyncadd [#allocation6], 4294957056 }
  0x49   :  { %1179 = dma.done.wait [#allocation9], 8192  }
  0x4a   :  { %1180 = vsyncadd [#allocation9], 4294959104  ;;  %v1191_v0 = vmov 0.0|0.0   ;;  %vm1192_vm0 = vmmov 0   ;;  %v1193_v1 = vmov 0.0   ;;  %v78_v2 = vld [vmem:[#allocation5] sm:$0xff] }
  0x4b   :  { %875 = vmatprep.subr.bf16.mxu0 %v1191_v0  ;;  %837 = vmatprep.mubr.msk.f32.mxu0 %vm1192_vm0, %v1193_v1  ;;  %v79_v3 = vld [vmem:[#allocation5 + $0x8] sm:$0xff]  ;;  %v80_v4 = vld [vmem:[#allocation5 + $0x10] sm:$0xff]  ;;  %v81_v6 = vld [vmem:[#allocation5 + $0x18] sm:$0xff]  ;;  %s1194_s23 = smov [#allocation10]  }
  0x4c   :  { %899 = vmatprep.subr.bf16.mxu1 %v1191_v0  ;;  %872 = vmatprep.mubr.msk.f32.mxu1 %vm1192_vm0, %v1193_v1  ;;  %v876_v5 = vpack.c.bf16 %v79_v3, %v78_v2  ;;  %v879_v7 = vpack.c.bf16 %v81_v6, %v80_v4  ;;  %v82_v8 = vld [vmem:[#allocation5 + $0x20] sm:$0xff]  ;;  %v83_v9 = vld [vmem:[#allocation5 + $0x28] sm:$0xff]  ;;  %v84_v11 = vld [vmem:[#allocation5 + $0x30] sm:$0xff]  ;;  %s689_s24 = sshll.u32 %s1194_s23, 4  ;;  %s690_s24 = int_to_ptr.vmem [resolvable:$true] %s689_s24 }
  0x4d   :  { %v882_v10 = vpack.c.bf16 %v83_v9, %v82_v8  ;;  %v85_v12 = vld [vmem:[#allocation5 + $0x38] sm:$0xff]  ;;  %v86_v14 = vld [vmem:[#allocation5 + $0x40] sm:$0xff]  ;;  %v87_v15 = vld [vmem:[#allocation5 + $0x48] sm:$0xff]  ;;  %s1153_s25 = scalar_lea.vmem %s690_s24, 128  ;;  %p1158_p5 = scmp.lt.s32.totalorder %s690_s24, %s690_s24 }
  0x4e   :  { %877 = vmatpush3.bf16.msra.mxu0 %v876_v5  ;;  %901 = vmatpush3.bf16.msra.mxu1 %v876_v5  ;;  %v885_v13 = vpack.c.bf16 %v85_v12, %v84_v11  ;;  %v888_v16 = vpack.c.bf16 %v87_v15, %v86_v14  ;;  %v88_v17 = vld [vmem:[#allocation5 + $0x50] sm:$0xff]  ;;  %v89_v18 = vld [vmem:[#allocation5 + $0x58] sm:$0xff]  ;;  %v90_v20 = vld [vmem:[#allocation5 + $0x60] sm:$0xff]  ;;  %p1154_p4 = scmp.ne.s32.totalorder %s690_s24, %s1153_s25  ;;  %p1159_p6 = scmp.lt.s32.totalorder %s1153_s25, %s1153_s25 }
  0x4f   :  { %878 = vmatprep.subr.bf16.mxu0 %v1191_v0  ;;  %902 = vmatprep.subr.bf16.mxu1 %v1191_v0  ;;  %v891_v19 = vpack.c.bf16 %v89_v18, %v88_v17  ;;  %v91_v21 = vld [vmem:[#allocation5 + $0x68] sm:$0xff]  ;;  %v92_v23 = vld [vmem:[#allocation5 + $0x70] sm:$0xff]  ;;  %v93_v24 = vld [vmem:[#allocation5 + $0x78] sm:$0xff] }
  0x50   :  { %v894_v22 = vpack.c.bf16 %v91_v21, %v90_v20  ;;  %v897_v25 = vpack.c.bf16 %v93_v24, %v92_v23  ;;  %v1286_v26 = vld [vmem:[#allocation2] sm:$0xff]  ;;  %v239_v27 = vld [vmem:[#allocation7 + $0x8] sm:$0xff]  ;;  %v238_v32 = vld [vmem:[#allocation7] sm:$0xff]  ;;  %p1160_p7 = por %p1159_p6, %p1158_p5 }
  0x51   :  { %v243_v28 = vld [vmem:[#allocation7 + $0x28] sm:$0xff]  ;;  %v241_v29 = vld [vmem:[#allocation7 + $0x18] sm:$0xff]  ;;  %v242_v33 = vld [vmem:[#allocation7 + $0x20] sm:$0xff] }
  0x52   :  { %880 = vmatpush3.bf16.msra.mxu0 %v879_v7  ;;  %904 = vmatpush3.bf16.msra.mxu1 %v879_v7  ;;  %v923_v30 = vpack.c.bf16 %v243_v28, %v239_v27  ;;  %v245_v31 = vld [vmem:[#allocation7 + $0x38] sm:$0xff]  ;;  %v925_v35 = vpack.c.bf16 %v242_v33, %v238_v32  ;;  %v247_v36 = vld [vmem:[#allocation7 + $0x48] sm:$0xff]  ;;  %v246_v39 = vld [vmem:[#allocation7 + $0x40] sm:$0xff]  ;;  %p1161_p8 = pnand %p1160_p7, %p1154_p4 }
  0x53   :  { %881 = vmatprep.subr.bf16.mxu0 %v1191_v0  ;;  %905 = vmatprep.subr.bf16.mxu1 %v1191_v0  ;;  %v955_v34 = vpack.c.bf16 %v245_v31, %v241_v29  ;;  %v251_v37 = vld [vmem:[#allocation7 + $0x68] sm:$0xff]  ;;  %v250_v40 = vld [vmem:[#allocation7 + $0x60] sm:$0xff]  ;;  %v240_v54 = vld [vmem:[#allocation7 + $0x10] sm:$0xff] }
  0x54   :  { %v927_v38 = vpack.c.bf16 %v251_v37, %v247_v36  ;;  %v929_v41 = vpack.c.bf16 %v250_v40, %v246_v39  ;;  %v255_v42 = vld [vmem:[#allocation7 + $0x88] sm:$0xff]  ;;  %v254_v45 = vld [vmem:[#allocation7 + $0x80] sm:$0xff]  ;;  %v244_v55 = vld [vmem:[#allocation7 + $0x30] sm:$0xff] }
  0x55   :  { %v259_v43 = vld [vmem:[#allocation7 + $0xa8] sm:$0xff]  ;;  %v258_v46 = vld [vmem:[#allocation7 + $0xa0] sm:$0xff]  ;;  %v249_v57 = vld [vmem:[#allocation7 + $0x58] sm:$0xff]  ;;  %v957_v61 = vpack.c.bf16 %v244_v55, %v240_v54 }
  0x56   :  { %883 = vmatpush3.bf16.msra.mxu0 %v882_v10  ;;  %907 = vmatpush3.bf16.msra.mxu1 %v882_v10  ;;  %v931_v44 = vpack.c.bf16 %v259_v43, %v255_v42  ;;  %v933_v47 = vpack.c.bf16 %v258_v46, %v254_v45  ;;  %v263_v48 = vld [vmem:[#allocation7 + $0xc8] sm:$0xff]  ;;  %v262_v51 = vld [vmem:[#allocation7 + $0xc0] sm:$0xff]  ;;  %v253_v58 = vld [vmem:[#allocation7 + $0x78] sm:$0xff] }
  0x57   :  { %884 = vmatprep.subr.bf16.mxu0 %v1191_v0  ;;  %908 = vmatprep.subr.bf16.mxu1 %v1191_v0  ;;  %v267_v49 = vld [vmem:[#allocation7 + $0xe8] sm:$0xff]  ;;  %v266_v52 = vld [vmem:[#allocation7 + $0xe0] sm:$0xff]  ;;  %v959_v63 = vpack.c.bf16 %v253_v58, %v249_v57  ;;  %v252_v2 = vld [vmem:[#allocation7 + $0x70] sm:$0xff] }
  0x58   :  { %v935_v50 = vpack.c.bf16 %v267_v49, %v263_v48  ;;  %v937_v53 = vpack.c.bf16 %v266_v52, %v262_v51  ;;  %v257_v3 = vld [vmem:[#allocation7 + $0x98] sm:$0xff]  ;;  %v256_v7 = vld [vmem:[#allocation7 + $0x90] sm:$0xff]  ;;  %v275_v17 = vld [vmem:[#allocation7 + $0x128] sm:$0xff] }
  0x59   :  { %v261_v4 = vld [vmem:[#allocation7 + $0xb8] sm:$0xff]  ;;  %v260_v8 = vld [vmem:[#allocation7 + $0xb0] sm:$0xff]  ;;  %v270_v20 = vld [vmem:[#allocation7 + $0x100] sm:$0xff] }
  0x5a   :  { %886 = vmatpush3.bf16.msra.mxu0 %v885_v13  ;;  %910 = vmatpush3.bf16.msra.mxu1 %v885_v13  ;;  %v963_v6 = vpack.c.bf16 %v261_v4, %v257_v3  ;;  %v265_v9 = vld [vmem:[#allocation7 + $0xd8] sm:$0xff]  ;;  %v965_v11 = vpack.c.bf16 %v260_v8, %v256_v7  ;;  %v264_v13 = vld [vmem:[#allocation7 + $0xd0] sm:$0xff]  ;;  %v274_v21 = vld [vmem:[#allocation7 + $0x120] sm:$0xff] }
  0x5b   :  { %887 = vmatprep.subr.bf16.mxu0 %v1191_v0  ;;  %911 = vmatprep.subr.bf16.mxu1 %v1191_v0  ;;  %v269_v10 = vld [vmem:[#allocation7 + $0xf8] sm:$0xff]  ;;  %v268_v14 = vld [vmem:[#allocation7 + $0xf0] sm:$0xff]  ;;  %v941_v23 = vpack.c.bf16 %v274_v21, %v270_v20  ;;  %v279_v28 = vld [vmem:[#allocation7 + $0x148] sm:$0xff] }
  0x5c   :  { %v967_v12 = vpack.c.bf16 %v269_v10, %v265_v9  ;;  %v969_v15 = vpack.c.bf16 %v268_v14, %v264_v13  ;;  %v273_v18 = vld [vmem:[#allocation7 + $0x118] sm:$0xff]  ;;  %v272_v24 = vld [vmem:[#allocation7 + $0x110] sm:$0xff]  ;;  %v283_v29 = vld [vmem:[#allocation7 + $0x168] sm:$0xff] }
  0x5d   :  { %v943_v31 = vpack.c.bf16 %v283_v29, %v279_v28  ;;  %v285_v32 = vld [vmem:[#allocation7 + $0x178] sm:$0xff]  ;;  %v278_v33 = vld [vmem:[#allocation7 + $0x140] sm:$0xff]  ;;  %v280_v37 = vld [vmem:[#allocation7 + $0x150] sm:$0xff] }
  0x5e   :  { %889 = vmatpush3.bf16.msra.mxu0 %v888_v16  ;;  %913 = vmatpush3.bf16.msra.mxu1 %v888_v16  ;;  %v271_v16 = vld [vmem:[#allocation7 + $0x108] sm:$0xff]  ;;  %v289_v42 = vld [vmem:[#allocation7 + $0x198] sm:$0xff]  ;;  %v286_v46 = vld [vmem:[#allocation7 + $0x180] sm:$0xff] }
  0x5f   :  { %890 = vmatprep.subr.bf16.mxu0 %v1191_v0  ;;  %914 = vmatprep.subr.bf16.mxu1 %v1191_v0  ;;  %v287_v39 = vld [vmem:[#allocation7 + $0x188] sm:$0xff]  ;;  %v293_v43 = vld [vmem:[#allocation7 + $0x1b8] sm:$0xff]  ;;  %v288_v48 = vld [vmem:[#allocation7 + $0x190] sm:$0xff] }
  0x60   :  { %v979_v45 = vpack.c.bf16 %v293_v43, %v289_v42  ;;  %v295_v51 = vld [vmem:[#allocation7 + $0x1c8] sm:$0xff]  ;;  %v297_v55 = vld [vmem:[#allocation7 + $0x1d8] sm:$0xff]  ;;  %v294_v57 = vld [vmem:[#allocation7 + $0x1c0] sm:$0xff] }
  0x61   :  { %v299_v52 = vld [vmem:[#allocation7 + $0x1e8] sm:$0xff]  ;;  %v518_v4 = vld [vmem:[#allocation8 + $0x180] sm:$0xff]  ;;  %v472_v21 = vld [vmem:[#allocation8 + $0x10] sm:$0xff] }
  0x62   :  { %892 = vmatpush3.bf16.msra.mxu0 %v891_v19  ;;  %916 = vmatpush3.bf16.msra.mxu1 %v891_v19  ;;  %v277_v19 = vld [vmem:[#allocation7 + $0x138] sm:$0xff]  ;;  %v951_v54 = vpack.c.bf16 %v299_v52, %v295_v51  ;;  %v487_v3 = vld [vmem:[#allocation8 + $0x88] sm:$0xff]  ;;  %v502_v13 = vld [vmem:[#allocation8 + $0x100] sm:$0xff] }
  0x63   :  { %893 = vmatprep.subr.bf16.mxu0 %v1191_v0  ;;  %917 = vmatprep.subr.bf16.mxu1 %v1191_v0  ;;  %v503_v14 = vld [vmem:[#allocation8 + $0x108] sm:$0xff]  ;;  %v505_v28 = vld [vmem:[#allocation8 + $0x118] sm:$0xff]  ;;  %v490_v29 = vld [vmem:[#allocation8 + $0xa0] sm:$0xff] }
  0x64   :  { %v1021_v20 = vpack.c.bf16 %v503_v14, %v502_v13  ;;  %v524_v42 = vld [vmem:[#allocation8 + $0x1b0] sm:$0xff]  ;;  %v525_v43 = vld [vmem:[#allocation8 + $0x1b8] sm:$0xff]  ;;  %v494_v52 = vld [vmem:[#allocation8 + $0xc0] sm:$0xff] }
  0x65   :  { %v509_v51 = vld [vmem:[#allocation8 + $0x138] sm:$0xff]  ;;  %v498_v14 = vld [vmem:[#allocation8 + $0xe0] sm:$0xff] }
  0x66   :  { %895 = vmatpush3.bf16.msra.mxu0 %v894_v22  ;;  %919 = vmatpush3.bf16.msra.mxu1 %v894_v22  ;;  %v971_v22 = vpack.c.bf16 %v277_v19, %v273_v18  ;;  %v521_v18 = vld [vmem:[#allocation8 + $0x198] sm:$0xff] }
  0x67   :  { %896 = vmatprep.subr.bf16.mxu0 %v1191_v0  ;;  %920 = vmatprep.subr.bf16.mxu1 %v1191_v0  ;;  %v248_v0 = vld [vmem:[#allocation7 + $0x50] sm:$0xff]  ;;  %v513_v13 = vld [vmem:[#allocation8 + $0x158] sm:$0xff] }
  0x68   :  { %v961_v5 = vpack.c.bf16 %v252_v2, %v248_v0  ;;  %v486_v2 = vld [vmem:[#allocation8 + $0x80] sm:$0xff] }
  0x6a   :  { %898 = vmatpush3.bf16.msra.mxu0 %v897_v25  ;;  %922 = vmatpush3.bf16.msra.mxu1 %v897_v25  ;;  %v276_v25 = vld [vmem:[#allocation7 + $0x130] sm:$0xff] }
  0x6b   :  { %924 = vmatprep.subr.bf16.mxu0 %v923_v30  ;;  %956 = vmatprep.subr.bf16.mxu1 %v955_v34  ;;  %v973_v27 = vpack.c.bf16 %v276_v25, %v272_v24  ;;  %v281_v30 = vld [vmem:[#allocation7 + $0x158] sm:$0xff]  ;;  %v282_v34 = vld [vmem:[#allocation7 + $0x160] sm:$0xff] }
  0x6c   :  { %v945_v36 = vpack.c.bf16 %v282_v34, %v278_v33 }
  0x6d   :  { %838 = vmatmul.mubr.f32.vlgmr.msra.gmra.mrb[0].mxu0 %v1286_v26 }
  0x6e   :  { %388 = vmatprep.mubr.f32.mxu0 %v1193_v1  ;;  %926 = vmatpush1.bf16.msra.mxu0 %v925_v35  ;;  %v975_v35 = vpack.c.bf16 %v285_v32, %v281_v30  ;;  %v491_v30 = vld [vmem:[#allocation8 + $0xa8] sm:$0xff] }
  0x6f   :  { %928 = vmatprep.subr.bf16.mxu0 %v927_v38  ;;  %v284_v38 = vld [vmem:[#allocation7 + $0x170] sm:$0xff]  ;;  %v523_v32 = vld [vmem:[#allocation8 + $0x1a8] sm:$0xff] }
  0x70   :  { %v977_v40 = vpack.c.bf16 %v284_v38, %v280_v37  ;;  %v995_v37 = vpack.c.bf16 %v491_v30, %v490_v29  ;;  %v506_v38 = vld [vmem:[#allocation8 + $0x120] sm:$0xff]  ;;  %v501_v29 = vld [vmem:[#allocation8 + $0xf8] sm:$0xff]  ;;  %v532_v30 = vld [vmem:[#allocation8 + $0x1f0] sm:$0xff] }
  0x72   :  { %930 = vmatpush1.bf16.msra.mxu0 %v929_v41  ;;  %v291_v41 = vld [vmem:[#allocation7 + $0x1a8] sm:$0xff] }
  0x73   :  { %932 = vmatprep.subr.bf16.mxu0 %v931_v44  ;;  %v947_v44 = vpack.c.bf16 %v291_v41, %v287_v39  ;;  %v507_v39 = vld [vmem:[#allocation8 + $0x128] sm:$0xff]  ;;  %v493_v41 = vld [vmem:[#allocation8 + $0xb8] sm:$0xff] }
  0x76   :  { %934 = vmatpush1.bf16.msra.mxu0 %v933_v47  ;;  %v290_v47 = vld [vmem:[#allocation7 + $0x1a0] sm:$0xff] }
  0x77   :  { %936 = vmatprep.subr.bf16.mxu0 %v935_v50  ;;  %v949_v49 = vpack.c.bf16 %v290_v47, %v286_v46  ;;  %v292_v50 = vld [vmem:[#allocation7 + $0x1b0] sm:$0xff]  ;;  %v477_v47 = vld [vmem:[#allocation8 + $0x38] sm:$0xff] }
  0x78   :  { %v476_v46 = vld [vmem:[#allocation8 + $0x30] sm:$0xff] }
  0x7a   :  { %938 = vmatpush1.bf16.msra.mxu0 %v937_v53  ;;  %v981_v53 = vpack.c.bf16 %v292_v50, %v288_v48  ;;  %v508_v50 = vld [vmem:[#allocation8 + $0x130] sm:$0xff] }
 0x140   :  { %v160_v56 = vpop.f32.mrb[0].mxu0 }
 0x141   :  { %v1291_v59 = vsub.f32 %v1286_v26, %v160_v56  ;;  %v839_v60 = vpop.f32.mrb[1].mxu0  ;;  %v301_v56 = vld [vmem:[#allocation7 + $0x1f8] sm:$0xff] }
 0x142   :  { %v983_v58 = vpack.c.bf16 %v301_v56, %v297_v55  ;;  %v298_v60 = vld [vmem:[#allocation7 + $0x1e0] sm:$0xff]  ;;  %v527_v55 = vld [vmem:[#allocation8 + $0x1c8] sm:$0xff]  ;;  %v1001_v56 = vpack.c.bf16 %v477_v47, %v476_v46 }
 0x143   :  { %v165_v62 = vmul.f32 %v1291_v59, %v1291_v59 }
 0x145   :  { %873 = vmatmul.mubr.f32.vlgmr.msra.gmra.mrb[0].mxu1 %v165_v62  ;;  %v300_v62 = vld [vmem:[#allocation7 + $0x1f0] sm:$0xff] }
 0x146   :  { %958 = vmatpush1.bf16.msra.mxu1 %v957_v61  ;;  %459 = vmatprep.mubr.f32.mxu1 %v1193_v1  ;;  %v939_v1 = vpack.c.bf16 %v275_v17, %v271_v16  ;;  %v296_v61 = vld [vmem:[#allocation7 + $0x1d0] sm:$0xff]  ;;  %v489_v16 = vld [vmem:[#allocation8 + $0x98] sm:$0xff] }
 0x147   :  { %960 = vmatprep.subr.bf16.mxu1 %v959_v63  ;;  %v953_v63 = vpack.c.bf16 %v298_v60, %v294_v57  ;;  %v985_v0 = vpack.c.bf16 %v300_v62, %v296_v61  ;;  %v520_v17 = vld [vmem:[#allocation8 + $0x190] sm:$0xff]  ;;  %v1033_v57 = vpack.c.bf16 %v509_v51, %v508_v50  ;;  %v479_v60 = vld [vmem:[#allocation8 + $0x48] sm:$0xff] }
 0x148   :  { %940 = vmatprep.subr.bf16.mxu0 %v939_v1  ;;  %v1023_v25 = vpack.c.bf16 %v521_v18, %v520_v17  ;;  %v531_v17 = vld [vmem:[#allocation8 + $0x1e8] sm:$0xff] }
 0x149   :  { %942 = vmatpush1.bf16.msra.mxu0 %v941_v23 }
 0x14a   :  { %962 = vmatpush1.bf16.msra.mxu1 %v961_v5  ;;  %944 = vmatprep.subr.bf16.mxu0 %v943_v31  ;;  %v987_v5 = vpack.c.bf16 %v487_v3, %v486_v2  ;;  %v522_v31 = vld [vmem:[#allocation8 + $0x1a0] sm:$0xff]  ;;  %v496_v2 = vld [vmem:[#allocation8 + $0xd0] sm:$0xff]  ;;  %v497_v3 = vld [vmem:[#allocation8 + $0xd8] sm:$0xff] }
 0x14b   :  { %964 = vmatprep.subr.bf16.mxu1 %v963_v6  ;;  %v519_v6 = vld [vmem:[#allocation8 + $0x188] sm:$0xff] }
 0x14c   :  { %v1019_v7 = vpack.c.bf16 %v519_v6, %v518_v4  ;;  %v528_v4 = vld [vmem:[#allocation8 + $0x1d0] sm:$0xff] }
 0x14d   :  { %946 = vmatpush1.bf16.msra.mxu0 %v945_v36  ;;  %v475_v36 = vld [vmem:[#allocation8 + $0x28] sm:$0xff] }
 0x14e   :  { %966 = vmatpush1.bf16.msra.mxu1 %v965_v11  ;;  %948 = vmatprep.subr.bf16.mxu0 %v947_v44  ;;  %v470_v11 = vld [vmem:[#allocation8] sm:$0xff] }
 0x14f   :  { %968 = vmatprep.subr.bf16.mxu1 %v967_v12  ;;  %v471_v12 = vld [vmem:[#allocation8 + $0x8] sm:$0xff] }
 0x150   :  { %v989_v19 = vpack.c.bf16 %v471_v12, %v470_v11  ;;  %v512_v12 = vld [vmem:[#allocation8 + $0x150] sm:$0xff] }
 0x151   :  { %950 = vmatpush1.bf16.msra.mxu0 %v949_v49  ;;  %v1031_v49 = vpack.c.bf16 %v525_v43, %v524_v42  ;;  %v302_v43 = vld [vmem:[%s1319_s3] sm:$0xf] }
 0x152   :  { %970 = vmatpush1.bf16.msra.mxu1 %v969_v15  ;;  %952 = vmatprep.subr.bf16.mxu0 %v951_v54  ;;  %v488_v15 = vld [vmem:[#allocation8 + $0x90] sm:$0xff]  ;;  %v526_v54 = vld [vmem:[#allocation8 + $0x1c0] sm:$0xff] }
 0x153   :  { %972 = vmatprep.subr.bf16.mxu1 %v971_v22  ;;  %v473_v22 = vld [vmem:[#allocation8 + $0x18] sm:$0xff]  ;;  %v991_v24 = vpack.c.bf16 %v489_v16, %v488_v15  ;;  %v1035_v62 = vpack.c.bf16 %v527_v55, %v526_v54  ;;  %v499_v15 = vld [vmem:[#allocation8 + $0xe8] sm:$0xff]  ;;  %v530_v16 = vld [vmem:[#allocation8 + $0x1e0] sm:$0xff] }
 0x154   :  { %v993_v33 = vpack.c.bf16 %v473_v22, %v472_v21  ;;  %v482_v21 = vld [vmem:[#allocation8 + $0x60] sm:$0xff]  ;;  %v483_v22 = vld [vmem:[#allocation8 + $0x68] sm:$0xff] }
 0x155   :  { %954 = vmatpush1.bf16.msra.mxu0 %v953_v63  ;;  %v510_v63 = vld [vmem:[#allocation8 + $0x140] sm:$0xff] }
 0x156   :  { %974 = vmatpush1.bf16.msra.mxu1 %v973_v27  ;;  %988 = vmatprep.subr.bf16.mxu0 %v987_v5  ;;  %v504_v27 = vld [vmem:[#allocation8 + $0x110] sm:$0xff]  ;;  %v529_v5 = vld [vmem:[#allocation8 + $0x1d8] sm:$0xff] }
 0x157   :  { %976 = vmatprep.subr.bf16.mxu1 %v975_v35  ;;  %v1025_v34 = vpack.c.bf16 %v505_v28, %v504_v27  ;;  %v474_v35 = vld [vmem:[#allocation8 + $0x20] sm:$0xff]  ;;  %v1039_v11 = vpack.c.bf16 %v529_v5, %v528_v4  ;;  %v500_v28 = vld [vmem:[#allocation8 + $0xf0] sm:$0xff] }
 0x158   :  { %v997_v44 = vpack.c.bf16 %v475_v36, %v474_v35 }
 0x15a   :  { %978 = vmatpush1.bf16.msra.mxu1 %v977_v40  ;;  %v492_v40 = vld [vmem:[#allocation8 + $0xb0] sm:$0xff] }
 0x15b   :  { %980 = vmatprep.subr.bf16.mxu1 %v979_v45  ;;  %v1029_v45 = vpack.c.bf16 %v507_v39, %v506_v38  ;;  %v999_v48 = vpack.c.bf16 %v493_v41, %v492_v40  ;;  %v304_v39 = vlaneseq }
 0x15d   :  { %v305_v40 = vshrl.u32 %v304_v39, 7 }
 0x15e   :  { %982 = vmatpush1.bf16.msra.mxu1 %v981_v53  ;;  %v495_v53 = vld [vmem:[#allocation8 + $0xc8] sm:$0xff] }
 0x15f   :  { %984 = vmatprep.subr.bf16.mxu1 %v983_v58  ;;  %v478_v58 = vld [vmem:[#allocation8 + $0x40] sm:$0xff]  ;;  %v1003_v61 = vpack.c.bf16 %v495_v53, %v494_v52  ;;  %v306_v41 = vsub.s32 0, %v305_v40  ;;  %v314_v42 = vsub.s32 2, %v305_v40 }
 0x160   :  { %v1005_v6 = vpack.c.bf16 %v479_v60, %v478_v58 }
 0x161   :  { %v307_v46 = vrot.slane %v302_v43, %v306_v41  ;;  %v315_v47 = vrot.slane %v302_v43, %v314_v42 }
 0x162   :  { %986 = vmatpush1.bf16.msra.mxu1 %v985_v0  ;;  %v511_v0 = vld [vmem:[#allocation8 + $0x148] sm:$0xff] }
 0x163   :  { %1020 = vmatprep.subr.bf16.mxu1 %v1019_v7  ;;  %v1037_v7 = vpack.c.bf16 %v511_v0, %v510_v63 }
 0x218   :  { %v232_v8 = vpop.f32.mrb[0].mxu1 }
 0x219   :  { %v233_v9 = vadd.f32 1e-05, %v232_v8  ;;  %v874_v10 = vpop.f32.mrb[1].mxu1  ;;  %v480_v8 = vld [vmem:[#allocation8 + $0x50] sm:$0xff] }
 0x21a   :  { %v1007_v10 = vpack.c.bf16 %v497_v3, %v496_v2  ;;  %v700_v2 = vld [vmem:[%s1321_s5] ss:$0 sm:$0xff] }
 0x21b   :  { %1063 = vrsqrt.f32 %v233_v9  ;;  %v481_v9 = vld [vmem:[#allocation8 + $0x58] sm:$0xff] }
 0x21c   :  { %v1009_v18 = vpack.c.bf16 %v481_v9, %v480_v8 }
 0x225   :  { %v1064_v1 = vpop.eup %1063 }
 0x226   :  { %v237_v23 = vmul.f32 %v1064_v1, %v1291_v59  ;;  %v1027_v59 = vpack.c.bf16 %v523_v32, %v522_v31  ;;  %v1041_v1 = vpack.c.bf16 %v513_v13, %v512_v12  ;;  %v1015_v31 = vpack.c.bf16 %v501_v29, %v500_v28  ;;  %v533_v32 = vld [vmem:[#allocation8 + $0x1f8] sm:$0xff] }
 0x227   :  { %v1047_v35 = vpack.c.bf16 %v533_v32, %v532_v30 }
 0x228   :  { %389 = vmatmul.mubr.f32.vlgmr.msra.gmra.mrb[2].mxu0 %v237_v23  ;;  %460 = vmatmul.mubr.f32.vlgmr.msra.gmra.mrb[2].mxu1 %v237_v23  ;;  %v514_v23 = vld [vmem:[#allocation8 + $0x160] sm:$0xff] }
 0x229   :  { %990 = vmatpush3.bf16.msra.mxu0 %v989_v19  ;;  %1022 = vmatpush3.bf16.msra.mxu1 %v1021_v20  ;;  %v1011_v19 = vpack.c.bf16 %v499_v15, %v498_v14  ;;  %v1043_v20 = vpack.c.bf16 %v531_v17, %v530_v16 }
 0x22a   :  { %992 = vmatprep.subr.bf16.mxu0 %v991_v24  ;;  %1024 = vmatprep.subr.bf16.mxu1 %v1023_v25  ;;  %v1013_v24 = vpack.c.bf16 %v483_v22, %v482_v21  ;;  %v515_v25 = vld [vmem:[#allocation8 + $0x168] sm:$0xff] }
 0x22b   :  { %v1045_v27 = vpack.c.bf16 %v515_v25, %v514_v23 }
 0x22d   :  { %994 = vmatpush3.bf16.msra.mxu0 %v993_v33  ;;  %1026 = vmatpush3.bf16.msra.mxu1 %v1025_v34  ;;  %v484_v33 = vld [vmem:[#allocation8 + $0x70] sm:$0xff]  ;;  %v485_v34 = vld [vmem:[#allocation8 + $0x78] sm:$0xff] }
 0x22e   :  { %996 = vmatprep.subr.bf16.mxu0 %v995_v37  ;;  %1028 = vmatprep.subr.bf16.mxu1 %v1027_v59  ;;  %v1017_v36 = vpack.c.bf16 %v485_v34, %v484_v33  ;;  %v516_v37 = vld [vmem:[#allocation8 + $0x170] sm:$0xff]  ;;  %v517_v59 = vld [vmem:[#allocation8 + $0x178] sm:$0xff] }
 0x22f   :  { %v1049_v38 = vpack.c.bf16 %v517_v59, %v516_v37 }
 0x231   :  { %998 = vmatpush3.bf16.msra.mxu0 %v997_v44  ;;  %1030 = vmatpush3.bf16.msra.mxu1 %v1029_v45  ;;  %v310_v44 = vsub.s32 1, %v305_v40  ;;  %v318_v45 = vsub.s32 3, %v305_v40 }
 0x232   :  { %1000 = vmatprep.subr.bf16.mxu0 %v999_v48  ;;  %1032 = vmatprep.subr.bf16.mxu1 %v1031_v49 }
 0x233   :  { %v311_v48 = vrot.slane %v302_v43, %v310_v44  ;;  %v319_v49 = vrot.slane %v302_v43, %v318_v45 }
 0x235   :  { %1002 = vmatpush3.bf16.msra.mxu0 %v1001_v56  ;;  %1034 = vmatpush3.bf16.msra.mxu1 %v1033_v57 }
 0x236   :  { %1004 = vmatprep.subr.bf16.mxu0 %v1003_v61  ;;  %1036 = vmatprep.subr.bf16.mxu1 %v1035_v62 }
 0x239   :  { %1006 = vmatpush3.bf16.msra.mxu0 %v1005_v6  ;;  %1038 = vmatpush3.bf16.msra.mxu1 %v1037_v7 }
 0x23a   :  { %1008 = vmatprep.subr.bf16.mxu0 %v1007_v10  ;;  %1040 = vmatprep.subr.bf16.mxu1 %v1039_v11 }
 0x23d   :  { %1010 = vmatpush3.bf16.msra.mxu0 %v1009_v18  ;;  %1042 = vmatpush3.bf16.msra.mxu1 %v1041_v1 }
 0x23e   :  { %1012 = vmatprep.subr.bf16.mxu0 %v1011_v19  ;;  %1044 = vmatprep.subr.bf16.mxu1 %v1043_v20 }
 0x241   :  { %1014 = vmatpush3.bf16.msra.mxu0 %v1013_v24  ;;  %1046 = vmatpush3.bf16.msra.mxu1 %v1045_v27 }
 0x242   :  { %1016 = vmatprep.subr.bf16.mxu0 %v1015_v31  ;;  %1048 = vmatprep.subr.bf16.mxu1 %v1047_v35 }
 0x245   :  { %1018 = vmatpush3.bf16.msra.mxu0 %v1017_v36  ;;  %1050 = vmatpush3.bf16.msra.mxu1 %v1049_v38 }
 0x2fb   :  { %v390_v50 = vpop.f32.mrb[2].mxu0  ;;  %v461_v51 = vpop.f32.mrb[2].mxu1 }
 0x2fc   :  { %v391_v52 = vadd.f32 %v390_v50, %v307_v46  ;;  %v462_v53 = vadd.f32 %v461_v51, %v315_v47  ;;  %v392_v54 = vpop.f32.mrb[3].mxu0  ;;  %v463_v55 = vpop.f32.mrb[3].mxu1 }
 0x2fd   :  { %v393_v56 = vadd.f32 %v392_v54, %v311_v48  ;;  %v464_v57 = vadd.f32 %v463_v55, %v319_v49 }
 0x2fe   :  { %v466_v61 = vmax.f32 %v391_v52, 0.0  ;;  %v468_v62 = vmax.f32 %v462_v53, 0.0 }
 0x2ff   :  { %v467_v58 = vmax.f32 %v393_v56, 0.0  ;;  %v469_v60 = vmax.f32 %v464_v57, 0.0 }
 0x301   :  { %605 = vmatprep.mubr.f32.mxu0 %v467_v58  ;;  %675 = vmatprep.mubr.f32.mxu1 %v469_v60 }
 0x302   :  { %606 = vmatmul.mubr.f32.vlgmr.msra.gmra.mrb[4].mxu0 %v466_v61  ;;  %676 = vmatmul.mubr.f32.vlgmr.msra.gmra.mrb[4].mxu1 %v468_v62 }
 0x3d5   :  { %v767_v63 = vpop.f32.mrb[4].mxu0  ;;  %v802_v0 = vpop.f32.mrb[4].mxu1 }
 0x3d6   :  { %v768_v3 = vpop.f32.mrb[5].mxu0  ;;  %v803_v4 = vpop.f32.mrb[5].mxu1 }
 0x3d7   :  { %v769_v5 = vadd.f32 %v768_v3, %v767_v63  ;;  %v804_v6 = vadd.f32 %v803_v4, %v802_v0 }
 0x3d9   :  { %v608_v7 = vadd.f32 %v769_v5, %v700_v2 }
 0x3db   :  { %v678_v8 = vadd.f32 %v804_v6, %v608_v7 }
 0x3dd   :  { %v681_v9 = vadd.f32 %v678_v8, %v1286_v26 }
 0x3df   :  { %682 = vst [vmem:[#allocation10] sm:$0xff] %v681_v9 }
 0x3e0   :  { %1164 = shalt.err (!%p1161_p8)
}
 0x3e1   :  { %s1165_s27 = scalar_lea.hbm %s1322_s6, 128 }
 0x3e2   :  { %p1166_p9 = scmp.ne.s32.totalorder %s1322_s6, %s1165_s27  ;;  %p1169_p10 = scmp.lt.u32.totalorder %s1165_s27, %s1322_s6 }
 0x3e4   :  { %p1171_p11 = pnand %p1169_p10, %p1166_p9 }
 0x3e6   :  { %1174 = shalt.err (!%p1171_p11)
}
 0x3e7   :  { %692 = dma.vmem_to_hbm [thread:$0]  %s690_s24, 128, %s1322_s6, [#allocation4]  }
 0x3e8   :  { %1181 = dma.done.wait [#allocation4], 128  }
 0x3e9   :  { %1182 = vsyncadd [#allocation4], 4294967168 }
 0x3ea   :  { %696 = vsyncpa [#allocation3], 1 }
 0x3eb   :  { %697 = vsyncpa [#allocation6], 1 }
 0x3ec   :  { %698 = vsyncpa [#allocation9], 1 }
 0x3ed   :  { %699 = vsyncpa [#allocation4], 1 }

</bundles_post_ra>
